<compile_context>
chip_gen: v6e
topology: v6e:2x2x1
jax: 0.10.0
libtpu: 0.0.40
codegen_flags: <defaults>
</compile_context>

<pallas_src>
import functools
import math

import numpy as np
import jax
import jax.numpy as jnp
from jax.experimental import pallas as pl
from jax.experimental.pallas import tpu as pltpu


def _round_up(x: int, m: int) -> int:
    return (x + m - 1) // m * m


def _round_down(x: int, m: int) -> int:
    return (x // m) * m


def _pos_emb_kernel(*refs, seq_len: int, bands: int, tile_l: int):
    """Writes one feature-major (out_dim, tile_l) tile.

    refs = (f_ref, phase_ref, out_ref) when bands > 0, else (out_ref,).
    Rows: [t, cos(f*w)  (= Re exp(-i f w)), -sin(f*w)  (= Im exp(-i f w))],
    with the sequence axis lane-dense (full vregs, unmasked lane stores).
    """
    out_ref = refs[-1]
    i = pl.program_id(0)

    # Global positions of this tile, (1, tile_l), on the lane axis.
    pos = (jax.lax.broadcasted_iota(jnp.int32, (1, tile_l), 1) + i * tile_l
           ).astype(jnp.float32)

    # Row 0: t = linspace(0, 1, seq_len)[pos] = pos / (seq_len - 1).
    out_ref[0:1, :] = (pos * jnp.float32(1.0 / (seq_len - 1))).astype(out_ref.dtype)

    if bands > 0:
        f_ref, phase_ref = refs[0], refs[1]
        w = pos * jnp.float32(2.0 * math.pi / seq_len)                 # (1, tile_l)
        # Single contiguous store: rows [1, bands] -> cos(f*w),
        #                          rows [bands+1, 2*bands] -> cos(f*w + pi/2) = -sin(f*w).
        theta = f_ref[...] * w + phase_ref[...]                        # (2*bands, tile_l)
        out_ref[1:1 + 2 * bands, :] = jnp.cos(theta).astype(out_ref.dtype)


def positional_embedding_feature_major(emb_dim: int, seq_len: int, L: int,
                                       *, dtype=jnp.float32,
                                       max_tile_l: int = 32768) -> jax.Array:
    """Kernel-native output: feature-major (1 + 2*bands, L) slab (no transpose)."""
    assert emb_dim > 1, "emb_dim must be > 1 (matches the PyTorch module)"
    assert seq_len > 1
    assert 0 < L <= seq_len
    bands = (emb_dim - 1) // 2
    out_dim = 1 + 2 * bands
    itemsize = np.dtype(dtype).itemsize

    # ---- tile selection -----------------------------------------------------
    # Per-step VMEM (double-buffered output block + f32 theta/pos temporaries),
    # kept under a conservative 12 MiB so it fits every generation's scoped default.
    vmem_budget = 12 * 1024 * 1024
    bytes_per_lane = 2 * _round_up(out_dim, 8) * itemsize + (2 * bands + 8) * 4
    lane_cap = max(128, _round_down(vmem_budget // bytes_per_lane, 128))
    tile_cap = min(max_tile_l, lane_cap)

    if L <= 256:
        tile_l = L                           # full-extent last dim: single tiny block
    else:
        # >= 2 grid steps so v7x's two TensorCores both get work (axis is "parallel"),
        # but tiles stay as large as the VMEM budget allows (per-step overhead amortized).
        tile_l = min(tile_cap, _round_up(-(-L // 2), 128))
    grid = (pl.cdiv(L, tile_l),)

    kernel = functools.partial(_pos_emb_kernel, seq_len=seq_len, bands=bands, tile_l=tile_l)

    # ---- trace-time constants (f extended for the fused cos/-sin store) -----
    inputs = ()
    in_specs = None
    if bands > 0:
        f = np.linspace(1e-4, bands - 1, bands, dtype=np.float32)
        f_ext = np.concatenate([f, f])[:, None].astype(np.float32)             # (2*bands, 1)
        phase = np.concatenate([np.zeros(bands, np.float32),
                                np.full(bands, math.pi / 2, np.float32)])[:, None]
        inputs = (jnp.asarray(f_ext), jnp.asarray(phase))
        in_specs = [pl.BlockSpec((2 * bands, 1), lambda i: (0, 0)),
                    pl.BlockSpec((2 * bands, 1), lambda i: (0, 0))]

    call_kwargs = dict(
        out_shape=jax.ShapeDtypeStruct((out_dim, L), dtype),
        grid=grid,
        out_specs=pl.BlockSpec((out_dim, tile_l), lambda i: (0, i)),
        compiler_params=pltpu.CompilerParams(
            dimension_semantics=("parallel",)),
    )
    if in_specs is not None:
        call_kwargs["in_specs"] = in_specs

    return pl.pallas_call(kernel, **call_kwargs)(*inputs)


def positional_embedding(emb_dim: int, seq_len: int, L: int, **kwargs) -> jax.Array:
    """Exact module semantics: PositionalEmbedding(emb_dim, seq_len).forward(L) -> (1, L, out_dim).

    Prefer `positional_embedding_feature_major` in consumers to avoid the layout
    transpose entirely; this transpose is plain XLA plumbing that fuses under jit.
    """
    z = positional_embedding_feature_major(emb_dim, seq_len, L, **kwargs)
    return jnp.transpose(z)[None]


def _reference(emb_dim: int, seq_len: int, L: int) -> jax.Array:
    """Pure-JAX port of the PyTorch module for verification."""
    bands = (emb_dim - 1) // 2
    t = jnp.linspace(0.0, 1.0, seq_len, dtype=jnp.float32)[None, :, None]
    t_rescaled = jnp.linspace(0.0, seq_len - 1, seq_len, dtype=jnp.float32)[None, :, None]
    w = 2.0 * math.pi * t_rescaled / seq_len
    f = jnp.linspace(0.0001, bands - 1, bands, dtype=jnp.float32)[None, None]
    z = jnp.exp(-1j * f.astype(jnp.complex64) * w.astype(jnp.complex64))
    z = jnp.concatenate([t, jnp.real(z), jnp.imag(z)], axis=-1)
    return z[:, :L]


if __name__ == "__main__":
    # The module has no tensor inputs; forward only takes the integer L.
    _ = jax.random.PRNGKey(0)  # kept for harness convention (all params deterministic)

    configs = [
        # (emb_dim, seq_len, L, max_tile_l)
        (9, 16, 8, 32768),      # single full-extent block
        (9, 512, 300, 32768),   # grid of 2 (v7x split), masked partial last block
        (9, 2048, 2048, 256),   # many-tile pipelined path
        (2, 16, 8, 32768),      # bands == 0 edge case (t-only output)
    ]
    for emb_dim, seq_len, L, max_tile_l in configs:
        out = jax.block_until_ready(
            positional_embedding(emb_dim, seq_len, L, max_tile_l=max_tile_l))
        ref = _reference(emb_dim, seq_len, L)
        bands = (emb_dim - 1) // 2
        assert out.shape == (1, L, 1 + 2 * bands), out.shape
        assert out.dtype == jnp.float32
        assert jnp.allclose(out, ref, atol=3e-5, rtol=1e-5), (
            emb_dim, seq_len, L, float(jnp.max(jnp.abs(out - ref))))

    # Transpose-free feature-major form (recommended consumer API).
    z_fm = jax.block_until_ready(positional_embedding_feature_major(9, 512, 300))
    assert z_fm.shape == (9, 300)
    assert jnp.allclose(z_fm.T[None], _reference(9, 512, 300), atol=3e-5, rtol=1e-5)

    # Optional bf16 output (kernel is writeback-bound: halves store bytes); math stays f32.
    z_bf16 = jax.block_until_ready(
        positional_embedding(9, 512, 300, dtype=jnp.bfloat16))
    assert z_bf16.dtype == jnp.bfloat16
    assert jnp.allclose(z_bf16.astype(jnp.float32), _reference(9, 512, 300), atol=2e-2)

    print("KERNEL_OK")
</pallas_src>

<mosaic_0001>
module attributes {stable_mosaic.version = 11 : i64} {
  func.func @_pos_emb_kernel(%arg0: i32, %arg1: memref<8x1xf32, #tpu.memory_space<vmem>>, %arg2: memref<8x1xf32, #tpu.memory_space<vmem>>, %arg3: memref<9x8xf32, #tpu.memory_space<vmem>>) attributes {dimension_semantics = [#tpu.dimension_semantics<parallel>], iteration_bounds = array<i64: 1>, scalar_prefetch = 0 : i64, scratch_operands = 0 : i64, tpu.core_type = #tpu.core_type<tc>, window_params = [{pipeline_mode = #tpu.pipeline_mode<synchronous>, transform_indices = @transform_0, window_bounds = array<i64: 8, 1>}, {pipeline_mode = #tpu.pipeline_mode<synchronous>, transform_indices = @transform_1, window_bounds = array<i64: 8, 1>}, {transform_indices = @transform_2, window_bounds = array<i64: 9, 8>}]} {
    %0 = tpu.iota {dimensions = array<i32: 1>} : vector<1x8xi32>
    %c8_i32 = arith.constant 8 : i32
    %1 = arith.muli %arg0, %c8_i32 : i32
    %2 = vector.broadcast %1 : i32 to vector<1x8xi32>
    %3 = arith.addi %0, %2 : vector<1x8xi32>
    %4 = arith.sitofp %3 : vector<1x8xi32> to vector<1x8xf32>
    %cst = arith.constant 0.0666666701 : f32
    %5 = vector.broadcast %cst : f32 to vector<1x8xf32>
    %6 = arith.mulf %4, %5 : vector<1x8xf32>
    %c0 = arith.constant 0 : index
    %c0_0 = arith.constant 0 : index
    %7 = vector.load %arg3[%c0, %c0_0] : memref<9x8xf32, #tpu.memory_space<vmem>>, vector<1x8xf32>
    tpu.vector_store %arg3[%c0, %c0_0], %6 {strides = array<i32>} : memref<9x8xf32, #tpu.memory_space<vmem>>, vector<1x8xf32>,
    %cst_1 = arith.constant 0.392699093 : f32
    %8 = vector.broadcast %cst_1 : f32 to vector<1x8xf32>
    %9 = arith.mulf %4, %8 : vector<1x8xf32>
    %c0_2 = arith.constant 0 : index
    %c0_3 = arith.constant 0 : index
    %10 = vector.load %arg1[%c0_2, %c0_3] : memref<8x1xf32, #tpu.memory_space<vmem>>, vector<8x1xf32>
    %11 = vector.broadcast %10 : vector<8x1xf32> to vector<8x8xf32>
    %12 = vector.broadcast %9 : vector<1x8xf32> to vector<8x8xf32>
    %13 = arith.mulf %11, %12 : vector<8x8xf32>
    %c0_4 = arith.constant 0 : index
    %c0_5 = arith.constant 0 : index
    %14 = vector.load %arg2[%c0_4, %c0_5] : memref<8x1xf32, #tpu.memory_space<vmem>>, vector<8x1xf32>
    %15 = vector.broadcast %14 : vector<8x1xf32> to vector<8x8xf32>
    %16 = arith.addf %13, %15 : vector<8x8xf32>
    %17 = math.cos %16 : vector<8x8xf32>
    %c1 = arith.constant 1 : index
    %c0_6 = arith.constant 0 : index
    %18 = vector.load %arg3[%c1, %c0_6] : memref<9x8xf32, #tpu.memory_space<vmem>>, vector<8x8xf32>
    tpu.vector_store %arg3[%c1, %c0_6], %17 {strides = array<i32>} : memref<9x8xf32, #tpu.memory_space<vmem>>, vector<8x8xf32>,
    return
  }
  func.func @transform_0(%arg0: i32) -> (i32, i32) {
    %c0_i32 = arith.constant 0 : i32
    %c0_i32_0 = arith.constant 0 : i32
    %c0_i32_1 = arith.constant 0 : i32
    return %c0_i32, %c0_i32_0 : i32, i32
  }
  func.func @transform_1(%arg0: i32) -> (i32, i32) {
    %c0_i32 = arith.constant 0 : i32
    %c0_i32_0 = arith.constant 0 : i32
    %c0_i32_1 = arith.constant 0 : i32
    return %c0_i32, %c0_i32_0 : i32, i32
  }
  func.func @transform_2(%arg0: i32) -> (i32, i32) {
    %c0_i32 = arith.constant 0 : i32
    %c0_i32_0 = arith.constant 0 : i32
    return %c0_i32, %arg0 : i32, i32
  }
}

</mosaic_0001>

<bundles_post_ra>
// kernel: tpu_custom_call.1
= control target key start
LH: loop header
LB: loop body
LE: loop exit
PB: predicated region body
PF: predicated region fallthrough
CT: control target
= control target key end

     0   :  { %v11_v0 = vlaneseq  ;;  %v164_v1 = vmov 0   ;;  %vm18_vm0 = vcmask 57344   ;;  %v165_v22 = vmov 683565275   ;;  %s219_s0 = inlined_call_operand.vmem [shape: f32[8,1], index: 0, kind: input, shape index: {}]   ;;  %s220_s1 = inlined_call_operand.vmem [shape: f32[8,1], index: 1, kind: input, shape index: {}]   ;;  %s221_s2 = inlined_call_operand.vmem [shape: f32[9,8], index: 2, kind: output, shape index: {}]  }
   0x1   :  { %159 = vset.pattern.permute.xlu0 %v164_v1  ;;  %v21_v2 = vld [vmem:[%s219_s0] sm:$0xff]  ;;  %v166_v24 = vmov 2475754826   ;;  %v167_v27 = vmov 2131351028   ;;  %vm138_vm12 = vcmask 64512  }
   0x2   :  { %24 = vperm.xlu0 %159, %v21_v2   ;;  %v12_v3 = vand.u32 127, %v11_v0  ;;  %v28_v4 = vld [vmem:[%s220_s1] sm:$0xff]  ;;  %v168_v30 = vmov 2102212464   ;;  %v169_v33 = vmov 920167782  }
   0x3   :  { %v170_v36 = vmov 1326507024  }
   0x4   :  { %v16_v5 = vcvt.s32.f32 %v12_v3 }
   0x6   :  { %31 = vperm.xlu0 %159, %v28_v4   ;;  %v17_v6 = vmul.f32 0.06666667, %v16_v5  ;;  %v20_v7 = vmul.f32 0.3926991, %v16_v5 }
   0x8   :  { %19 = vst.msk [vmem:[%s221_s2] sm:$0x1] %vm18_vm0, %v17_v6 }
  0x7d   :  { %v25_v8 = vpop.permute.xlu0 %24 }
  0x7e   :  { %v27_v9 = vmul.f32 %v25_v8, %v20_v7 }
  0x81   :  { %v32_v10 = vpop.permute.xlu0 %31 }
  0x82   :  { %v195_v11 = vadd.f32 %v32_v10, %v27_v9 }
  0x84   :  { %v38_v12 = vand.u32 2139095040, %v195_v11  ;;  %v35_v16 = vand.u32 2147483647, %v195_v11  ;;  %vm37_vm8 = vcmp.lt.s32.totalorder %v195_v11, 0  ;;  %vm127_vm14 = vweird.f32 %v195_v11 }
  0x86   :  { %v39_v13 = vshrl.u32 %v38_v12, 23  ;;  %v42_v19 = vand.u32 8388607, %v35_v16  ;;  %vm36_vm9 = vcmp.le.f32.partialorder %v35_v16, 0.7853982 }
  0x88   :  { %v144_v14 = vadd.s32 4294967169, %v39_v13  ;;  %v43_v38 = vor.u32 8388608, %v42_v19 }
  0x8a   :  { %v45_v15 = vadd.s32 1, %v144_v14  ;;  %v83_v52 = vshll.u32 %v43_v38, 8 }
  0x8c   :  { %vm46_vm1 = vcmp.gt.s32.totalorder %v45_v15, 0 }
  0x8d   :  { %v47_v17 = vsel %vm46_vm1, %v45_v15, 0 }
  0x8e   :  { %v49_v18 = vand.u32 31, %v47_v17  ;;  %v48_v21 = vshrl.u32 %v47_v17, 5 }
  0x90   :  { %v50_v20 = vsub.s32 32, %v49_v18  ;;  %v52_v23 = vshll.u32 %v165_v22, %v49_v18  ;;  %v55_v25 = vshll.u32 %v166_v24, %v49_v18  ;;  %v58_v29 = vshll.u32 %v167_v27, %v49_v18 }
  0x91   :  { %v61_v32 = vshll.u32 %v168_v30, %v49_v18  ;;  %v64_v35 = vshll.u32 %v169_v33, %v49_v18  ;;  %vm67_vm2 = vcmp.lt.s32.totalorder %v48_v21, 1  ;;  %vm70_vm3 = vcmp.lt.s32.totalorder %v48_v21, 4 }
  0x92   :  { %v53_v26 = vshrl.u32 %v166_v24, %v50_v20  ;;  %v56_v28 = vshrl.u32 %v167_v27, %v50_v20  ;;  %v59_v31 = vshrl.u32 %v168_v30, %v50_v20  ;;  %v62_v34 = vshrl.u32 %v169_v33, %v50_v20 }
  0x93   :  { %v65_v37 = vshrl.u32 %v170_v36, %v50_v20  ;;  %v51_v47 = vshrl.u32 %v165_v22, %v50_v20  ;;  %vm69_vm4 = vcmp.lt.s32.totalorder %v48_v21, 3  ;;  %vm68_vm5 = vcmp.lt.s32.totalorder %v48_v21, 2 }
  0x94   :  { %v54_v39 = vor.u32 %v53_v26, %v52_v23  ;;  %v57_v40 = vor.u32 %v56_v28, %v55_v25  ;;  %v60_v41 = vor.u32 %v59_v31, %v58_v29  ;;  %v63_v42 = vor.u32 %v62_v34, %v61_v32 }
  0x95   :  { %v66_v43 = vor.u32 %v65_v37, %v64_v35 }
  0x96   :  { %v72_v44 = vsel %vm70_vm3, %v60_v41, 2102212464  ;;  %v75_v45 = vsel %vm67_vm2, %v54_v39, %v57_v40  ;;  %v79_v46 = vsel %vm67_vm2, %v57_v40, %v60_v41  ;;  %v76_v48 = vsel %vm70_vm3, %v63_v42, 920167782 }
  0x97   :  { %v80_v49 = vsel %vm70_vm3, %v66_v43, 1326507024  ;;  %v77_v50 = vsel %vm69_vm4, %v60_v41, %v76_v48  ;;  %v71_v53 = vsel %vm67_vm2, %v51_v47, %v54_v39  ;;  %v73_v54 = vsel %vm69_vm4, %v57_v40, %v72_v44 }
  0x98   :  { %v81_v51 = vsel %vm69_vm4, %v63_v42, %v80_v49  ;;  %v78_v55 = vsel %vm68_vm5, %v75_v45, %v77_v50  ;;  %v74_v61 = vsel %vm68_vm5, %v71_v53, %v73_v54 }
  0x99   :  { %v82_v56 = vsel %vm68_vm5, %v79_v46, %v81_v51  ;;  %v204_v59 = vmul.u32.u64.low %v83_v52, %v78_v55  ;;  %v205_v60 = vmul.u32.u64.high %v83_v52, %v78_v55, %v204_v59  ;;  %v90_v63 = vmul.u32 %v83_v52, %v74_v61 }
  0x9a   :  { %v201_v57 = vmul.u32.u64.low %v83_v52, %v82_v56  ;;  %v202_v58 = vmul.u32.u64.high %v83_v52, %v82_v56, %v201_v57 }
  0x9b   :  { %v93_v62 = vadd.s32 1, %v205_v60 }
  0x9c   :  { %vm92_vm6 = vc.u32 %v202_v58, %v204_v59  ;;  %v91_v12 = vadd.s32 %v204_v59, %v202_v58 }
  0x9d   :  { %v94_v0 = vsel %vm92_vm6, %v93_v62, %v205_v60 }
  0x9e   :  { %v95_v1 = vadd.s32 %v94_v0, %v90_v63 }
  0xa0   :  { %v96_v2 = vadd.s32 536870912, %v95_v1 }
  0xa2   :  { %v97_v3 = vshrl.u32 %v96_v2, 30 }
  0xa4   :  { %v98_v4 = vshll.u32 %v97_v3, 30  ;;  %v121_v28 = vsub.s32 4, %v97_v3 }
  0xa6   :  { %v99_v5 = vsub.s32 %v95_v1, %v98_v4  ;;  %v122_v29 = vsel %vm37_vm8, %v121_v28, %v97_v3 }
  0xa7   :  { %v124_v30 = vsel %vm36_vm9, 0, %v122_v29 }
  0xa8   :  { %v101_v6 = vsub.s32 0, %v99_v5  ;;  %v128_v31 = vand.u32 3, %v124_v30 }
  0xaa   :  { %v145_v7 = vmin.u32 %v101_v6, %v99_v5  ;;  %vm133_vm10 = vcmp.eq.s32.totalorder %v128_v31, 2  ;;  %vm130_vm11 = vcmp.eq.s32.totalorder %v128_v31, 0  ;;  %vm129_vm13 = vcmp.lt.s32.totalorder %v128_v31, 2 }
  0xac   :  { %v103_v8 = vclz %v145_v7 }
  0xae   :  { %v146_v9 = vadd.s32 4294967294, %v103_v8 }
  0xb0   :  { %vm147_vm7 = vcmp.lt.s32.totalorder %v146_v9, 0 }
  0xb1   :  { %v106_v10 = vsel %vm147_vm7, 0, %v146_v9 }
  0xb2   :  { %v107_v13 = vsub.s32 32, %v106_v10  ;;  %v111_v14 = vsub.s32 4294967266, %v106_v10  ;;  %v108_v15 = vshll.u32 %v99_v5, %v106_v10 }
  0xb4   :  { %v109_v17 = vshrl.u32 %v91_v12, %v107_v13  ;;  %v112_v18 = vadd.s32 127, %v111_v14 }
  0xb6   :  { %v110_v19 = vor.u32 %v109_v17, %v108_v15  ;;  %v113_v20 = vshll.u32 %v112_v18, 23 }
  0xb8   :  { %v114_v21 = vor.u32 4788187, %v113_v20  ;;  %v117_v23 = vcvt.s32.f32 %v110_v19 }
  0xba   :  { %v115_v22 = vand.u32 2147483647, %v114_v21 }
  0xbc   :  { %v118_v24 = vmul.f32 %v117_v23, %v115_v22 }
  0xbe   :  { %v119_v25 = vxor.u32 2147483648, %v118_v24 }
  0xc0   :  { %v120_v26 = vsel %vm37_vm8, %v119_v25, %v118_v24 }
  0xc1   :  { %v123_v27 = vsel %vm36_vm9, %v195_v11, %v120_v26 }
  0xc2   :  { %160 = vcosq.f32 %v123_v27 }
  0xc3   :  { %162 = vsinq.f32 %v123_v27 }
  0xcf   :  { %v161_v32 = vpop.eup %160 }
  0xd0   :  { %v163_v33 = vpop.eup %162  ;;  %v134_v34 = vxor.u32 2147483648, %v161_v32 }
  0xd1   :  { %v131_v35 = vxor.u32 2147483648, %v163_v33 }
  0xd2   :  { %v135_v36 = vsel %vm133_vm10, %v134_v34, %v163_v33 }
  0xd3   :  { %v132_v37 = vsel %vm130_vm11, %v161_v32, %v131_v35 }
  0xd4   :  { %v136_v16 = vsel %vm129_vm13, %v132_v37, %v135_v36 }
  0xd5   :  { %v137_v38 = vsel %vm127_vm14, nan, %v136_v16 }
  0xd6   :  { %139 = vst.msk [vmem:[%s221_s2 + $0x1] sm:$0xff] %vm138_vm12, %v137_v38 }

</bundles_post_ra>
